<compile_context>
chip_gen: v7x
topology: tpu7x:2x2x1
jax: 0.10.0
libtpu: 0.0.40
codegen_flags: <defaults>
</compile_context>

<pallas_src>
import functools

import jax
import jax.numpy as jnp
import numpy as np
from jax.experimental import pallas as pl
from jax.experimental.pallas import tpu as pltpu


# ------------------------------ fused kernel ------------------------------

def _abf_fused_kernel(*refs, H, W, fuse):
    if fuse:
        (x_ref, y_ref, w1_ref, b1_ref, wax_ref, way_ref, batt_ref,
         w2_ref, b2_ref, mask_ref, out_ref, xmid_ref) = refs
    else:
        (x_ref, w1_ref, b1_ref, w2_ref, b2_ref, mask_ref,
         out_ref, xmid_ref) = refs

    hw = H * W
    f32 = jnp.float32
    bf16 = jnp.bfloat16

    # ---- conv1 (1x1, no bias) with BN scale folded into w1 ----------------
    # bf16 MXU operands, f32 accumulation; +shift stays f32 on the VPU.
    x_bf = x_ref[0].astype(bf16)                              # (Cin, HW)
    x_mid = jnp.dot(w1_ref[...], x_bf,
                    preferred_element_type=f32) + b1_ref[...]  # (Cmid, HW) f32

    # ---- attention conv (1x1 + bias + sigmoid) + weighted fusion ----------
    if fuse:
        y = y_ref[0]                                          # (Cmid, HW) f32
        logits = (jnp.dot(wax_ref[...], x_mid.astype(bf16),
                          preferred_element_type=f32)
                  + jnp.dot(way_ref[...], y.astype(bf16),
                            preferred_element_type=f32)
                  + batt_ref[...])                            # (2, HW) f32
        z = jax.nn.sigmoid(logits)
        x_mid = x_mid * z[0:1, :] + y * z[1:2, :]

    xmid_ref[0] = x_mid.astype(xmid_ref.dtype)

    # ---- conv2 (3x3, pad=1, no bias) with BN scale folded into w2 ---------
    # Accumulated 9-tap matmul: each tap is a static lane rotation of x_mid,
    # a (1, HW)-broadcast border-mask multiply, a bf16 cast, and one
    # (Cout, Cmid) x (Cmid, HW) dot accumulated in f32.  No im2col buffer.
    cout = out_ref.shape[1]
    acc = jnp.zeros((cout, hw), f32)
    t = 0
    for dy in (-1, 0, 1):
        for dx in (-1, 0, 1):
            off = dy * W + dx
            if off == 0:
                shifted = x_mid
            else:
                shifted = pltpu.roll(x_mid, shift=(-off) % hw, axis=1)
            tap = (shifted * mask_ref[t:t + 1, :]).astype(bf16)
            acc = acc + jnp.dot(w2_ref[t], tap, preferred_element_type=f32)
            t += 1
    out_ref[0] = (acc + b2_ref[...]).astype(out_ref.dtype)


# ------------------------------ ABF wrapper ------------------------------

def nearest_resize_nchw(y, out_h, out_w):
    """PyTorch F.interpolate(mode='nearest') on NCHW: src = floor(dst*in/out)."""
    n, c, hy, wy = y.shape
    if out_h % hy == 0 and out_w % wy == 0:
        sh, sw = out_h // hy, out_w // wy
        y6 = jnp.broadcast_to(y[:, :, :, None, :, None], (n, c, hy, sh, wy, sw))
        return y6.reshape(n, c, out_h, out_w)
    ri = (jnp.arange(out_h) * hy) // out_h
    ci = (jnp.arange(out_w) * wy) // out_w
    return y[:, :, ri[:, None], ci[None, :]]


def _border_masks(h, w):
    """(9, H*W) f32 validity masks for the 3x3 taps, tap order dy-major."""
    hw = h * w
    rr = np.arange(hw) // w
    cc = np.arange(hw) % w
    masks = np.zeros((9, hw), np.float32)
    t = 0
    for dy in (-1, 0, 1):
        for dx in (-1, 0, 1):
            valid = ((rr + dy >= 0) & (rr + dy < h) &
                     (cc + dx >= 0) & (cc + dx < w))
            masks[t] = valid.astype(np.float32)
            t += 1
    return masks


@functools.partial(jax.jit, static_argnames=("shape", "fuse"))
def abf_forward(params, x_nchw, y_nchw=None, shape=None, fuse=True):
    n, cin, h, w = x_nchw.shape
    hw = h * w
    cmid = params["w1"].shape[0]
    cout = params["w2"].shape[0]
    bf16 = jnp.bfloat16

    x_flat = x_nchw.reshape(n, cin, hw)

    # Fold BN scales into the conv weights (one-time, host/XLA side); only the
    # +shift adds remain in the kernel.  Weights cast to bf16 once here.
    w1f = (params["w1"] * params["scale1"][:, None]).astype(bf16)      # (Cmid,Cin)
    b1 = params["shift1"].reshape(cmid, 1)
    w2f = params["w2"] * params["scale2"][:, None, None, None]         # (Cout,Cmid,3,3)
    # (Cout, Cmid, ky, kx) -> (ky, kx, Cout, Cmid) -> (9, Cout, Cmid):
    # tap index t = (dy+1)*3 + (dx+1), matching the kernel's tap loop order.
    w2_taps = jnp.transpose(w2f, (2, 3, 0, 1)).reshape(9, cout, cmid).astype(bf16)
    b2 = params["shift2"].reshape(cout, 1)

    masks = jnp.asarray(_border_masks(h, w))                           # (9, HW) f32

    full2 = lambda b: (0, 0)
    full3 = lambda b: (0, 0, 0)
    per_img = lambda c: pl.BlockSpec((1, c, hw), lambda b: (b, 0, 0))

    # Cost estimate (helps XLA schedule the resize / reshape glue around us).
    flops = 2 * n * hw * cmid * cin + 2 * n * hw * 9 * cmid * cout
    transcendentals = 0
    bytes_accessed = (x_flat.size * 4 + n * cout * hw * 4 + n * cmid * hw * 4
                      + 2 * (w1f.size + w2_taps.size)
                      + 4 * (b1.size + b2.size + masks.size))

    if fuse:
        y_flat = nearest_resize_nchw(y_nchw, shape, shape).reshape(n, cmid, hw)
        watt_x = params["watt"][:, :cmid].astype(bf16)                 # (2, Cmid)
        watt_y = params["watt"][:, cmid:].astype(bf16)                 # (2, Cmid)
        batt = params["batt"].reshape(2, 1)
        flops += 2 * n * hw * 2 * (2 * cmid) + 4 * n * cmid * hw
        transcendentals = 2 * n * hw
        bytes_accessed += y_flat.size * 4 + 2 * (watt_x.size + watt_y.size) + 4 * batt.size

        inputs = (x_flat, y_flat, w1f, b1, watt_x, watt_y, batt, w2_taps, b2, masks)
        in_specs = [
            per_img(cin),
            per_img(cmid),
            pl.BlockSpec((cmid, cin), full2),
            pl.BlockSpec((cmid, 1), full2),
            pl.BlockSpec((2, cmid), full2),
            pl.BlockSpec((2, cmid), full2),
            pl.BlockSpec((2, 1), full2),
            pl.BlockSpec((9, cout, cmid), full3),
            pl.BlockSpec((cout, 1), full2),
            pl.BlockSpec((9, hw), full2),
        ]
    else:
        inputs = (x_flat, w1f, b1, w2_taps, b2, masks)
        in_specs = [
            per_img(cin),
            pl.BlockSpec((cmid, cin), full2),
            pl.BlockSpec((cmid, 1), full2),
            pl.BlockSpec((9, cout, cmid), full3),
            pl.BlockSpec((cout, 1), full2),
            pl.BlockSpec((9, hw), full2),
        ]

    kernel = functools.partial(_abf_fused_kernel, H=h, W=w, fuse=fuse)

    out, xmid = pl.pallas_call(
        kernel,
        out_shape=(jax.ShapeDtypeStruct((n, cout, hw), x_nchw.dtype),
                   jax.ShapeDtypeStruct((n, cmid, hw), x_nchw.dtype)),
        grid_spec=pltpu.PrefetchScalarGridSpec(
            num_scalar_prefetch=0,
            grid=(n,),
            in_specs=in_specs,
            out_specs=(per_img(cout), per_img(cmid)),
        ),
        compiler_params=pltpu.CompilerParams(
            dimension_semantics=("parallel",)),
        cost_estimate=pl.CostEstimate(
            flops=int(flops),
            transcendentals=int(transcendentals),
            bytes_accessed=int(bytes_accessed)),
    )(*inputs)
    return out.reshape(n, cout, h, w), xmid.reshape(n, cmid, h, w)


# --------------------------- pure-JAX reference ---------------------------

def abf_reference(params, x, y=None, shape=None, fuse=True):
    cmid = params["w1"].shape[0]
    cout = params["w2"].shape[0]
    x1 = jnp.einsum("oc,nchw->nohw", params["w1"], x)
    x1 = (x1 * params["scale1"].reshape(1, cmid, 1, 1)
          + params["shift1"].reshape(1, cmid, 1, 1))
    if fuse:
        y_up = nearest_resize_nchw(y, shape, shape)
        z_in = jnp.concatenate([x1, y_up], axis=1)
        logits = (jnp.einsum("oc,nchw->nohw", params["watt"], z_in)
                  + params["batt"].reshape(1, 2, 1, 1))
        z = jax.nn.sigmoid(logits)
        x1 = x1 * z[:, 0:1] + y_up * z[:, 1:2]
    y_out = jax.lax.conv_general_dilated(
        x1, params["w2"], window_strides=(1, 1), padding="SAME",
        dimension_numbers=("NCHW", "OIHW", "NCHW"))
    y_out = (y_out * params["scale2"].reshape(1, cout, 1, 1)
             + params["shift2"].reshape(1, cout, 1, 1))
    return y_out, x1


# ------------------------------ param setup ------------------------------

def bn_fold(key, c, eps=1e-5):
    k1, k2, k3, k4 = jax.random.split(key, 4)
    gamma = 1.0 + 0.1 * jax.random.uniform(k1, (c,), jnp.float32, -1.0, 1.0)
    beta = 0.1 * jax.random.uniform(k2, (c,), jnp.float32, -1.0, 1.0)
    mean = 0.1 * jax.random.uniform(k3, (c,), jnp.float32, -1.0, 1.0)
    var = 1.0 + 0.1 * jax.random.uniform(k4, (c,), jnp.float32, 0.0, 1.0)
    scale = gamma / jnp.sqrt(var + eps)
    shift = beta - mean * scale
    return scale, shift


def make_params(key, cin, cmid, cout):
    ks = jax.random.split(key, 6)
    b1 = (3.0 / cin) ** 0.5                       # kaiming_uniform_(a=1)
    w1 = jax.random.uniform(ks[0], (cmid, cin), jnp.float32, -b1, b1)
    b2 = (3.0 / (cmid * 9)) ** 0.5
    w2 = jax.random.uniform(ks[1], (cout, cmid, 3, 3), jnp.float32, -b2, b2)
    ba = (1.0 / (2 * cmid)) ** 0.5                # Conv2d(2*cmid, 2, 1) + bias
    watt = jax.random.uniform(ks[2], (2, 2 * cmid), jnp.float32, -ba, ba)
    batt = jax.random.uniform(ks[3], (2,), jnp.float32, -ba, ba)
    scale1, shift1 = bn_fold(ks[4], cmid)
    scale2, shift2 = bn_fold(ks[5], cout)
    return dict(w1=w1, w2=w2, watt=watt, batt=batt,
                scale1=scale1, shift1=shift1, scale2=scale2, shift2=shift2)


# --------------------------------- main ---------------------------------

if __name__ == "__main__":
    key = jax.random.PRNGKey(0)
    k_p, k_x, k_y = jax.random.split(key, 3)

    # ABF(in_channel=16, mid_channel=8, out_channel=16, fuse=True)
    cin, cmid, cout = 16, 8, 16
    n, h, w = 2, 16, 16
    params = make_params(k_p, cin, cmid, cout)

    x = jax.random.normal(k_x, (n, cin, h, w), jnp.float32)             # NCHW
    y = jax.random.normal(k_y, (n, cmid, h // 2, w // 2), jnp.float32)  # NCHW

    # fuse=True path
    out_y, out_x = abf_forward(params, x, y, shape=h, fuse=True)
    out_y, out_x = jax.block_until_ready((out_y, out_x))
    ref_y, ref_x = abf_reference(params, x, y, shape=h, fuse=True)
    np.testing.assert_allclose(np.asarray(out_x), np.asarray(ref_x),
                               rtol=2e-2, atol=2e-2)
    np.testing.assert_allclose(np.asarray(out_y), np.asarray(ref_y),
                               rtol=2e-2, atol=2e-2)
    assert out_y.shape == (n, cout, h, w) and out_x.shape == (n, cmid, h, w)

    # fuse=False path
    out_y2, out_x2 = abf_forward(params, x, fuse=False)
    out_y2, out_x2 = jax.block_until_ready((out_y2, out_x2))
    ref_y2, ref_x2 = abf_reference(params, x, fuse=False)
    np.testing.assert_allclose(np.asarray(out_x2), np.asarray(ref_x2),
                               rtol=2e-2, atol=2e-2)
    np.testing.assert_allclose(np.asarray(out_y2), np.asarray(ref_y2),
                               rtol=2e-2, atol=2e-2)

    print("KERNEL_OK")
</pallas_src>

<mosaic_0001>
module attributes {stable_mosaic.version = 11 : i64} {
  func.func @_abf_fused_kernel(%arg0: i32, %arg1: memref<1x16x256xf32, #tpu.memory_space<vmem>>, %arg2: memref<1x8x256xf32, #tpu.memory_space<vmem>>, %arg3: memref<8x16xbf16, #tpu.memory_space<vmem>>, %arg4: memref<8x1xf32, #tpu.memory_space<vmem>>, %arg5: memref<2x8xbf16, #tpu.memory_space<vmem>>, %arg6: memref<2x8xbf16, #tpu.memory_space<vmem>>, %arg7: memref<2x1xf32, #tpu.memory_space<vmem>>, %arg8: memref<9x16x8xbf16, #tpu.memory_space<vmem>>, %arg9: memref<16x1xf32, #tpu.memory_space<vmem>>, %arg10: memref<9x256xf32, #tpu.memory_space<vmem>>, %arg11: memref<1x16x256xf32, #tpu.memory_space<vmem>>, %arg12: memref<1x8x256xf32, #tpu.memory_space<vmem>>) attributes {dimension_semantics = [#tpu.dimension_semantics<parallel>], iteration_bounds = array<i64: 2>, scalar_prefetch = 0 : i64, scratch_operands = 0 : i64, tpu.core_type = #tpu.core_type<tc>, window_params = [{transform_indices = @transform_0, window_bounds = array<i64: 1, 16, 256>}, {transform_indices = @transform_1, window_bounds = array<i64: 1, 8, 256>}, {pipeline_mode = #tpu.pipeline_mode<synchronous>, transform_indices = @transform_2, window_bounds = array<i64: 8, 16>}, {pipeline_mode = #tpu.pipeline_mode<synchronous>, transform_indices = @transform_3, window_bounds = array<i64: 8, 1>}, {pipeline_mode = #tpu.pipeline_mode<synchronous>, transform_indices = @transform_4, window_bounds = array<i64: 2, 8>}, {pipeline_mode = #tpu.pipeline_mode<synchronous>, transform_indices = @transform_5, window_bounds = array<i64: 2, 8>}, {pipeline_mode = #tpu.pipeline_mode<synchronous>, transform_indices = @transform_6, window_bounds = array<i64: 2, 1>}, {pipeline_mode = #tpu.pipeline_mode<synchronous>, transform_indices = @transform_7, window_bounds = array<i64: 9, 16, 8>}, {pipeline_mode = #tpu.pipeline_mode<synchronous>, transform_indices = @transform_8, window_bounds = array<i64: 16, 1>}, {pipeline_mode = #tpu.pipeline_mode<synchronous>, transform_indices = @transform_9, window_bounds = array<i64: 9, 256>}, {transform_indices = @transform_10, window_bounds = array<i64: 1, 16, 256>}, {transform_indices = @transform_11, window_bounds = array<i64: 1, 8, 256>}]} {
    %c0 = arith.constant 0 : index
    %c0_0 = arith.constant 0 : index
    %c0_1 = arith.constant 0 : index
    %0 = vector.load %arg1[%c0, %c0_0, %c0_1] : memref<1x16x256xf32, #tpu.memory_space<vmem>>, vector<1x16x256xf32>
    %1 = vector.shape_cast %0 : vector<1x16x256xf32> to vector<16x256xf32>
    %2 = arith.truncf %1 : vector<16x256xf32> to vector<16x256xbf16>
    %c0_2 = arith.constant 0 : index
    %c0_3 = arith.constant 0 : index
    %3 = vector.load %arg3[%c0_2, %c0_3] : memref<8x16xbf16, #tpu.memory_space<vmem>>, vector<8x16xbf16>
    %cst = arith.constant dense<0.000000e+00> : vector<8x256xf32>
    %4 = tpu.matmul %3, %2, %cst {dimension_numbers = #tpu.dot_dimension_numbers<[1], [0], [0], [1], [0, 0, 1, 1], [], []>} : vector<8x16xbf16>, vector<16x256xbf16>, vector<8x256xf32> -> vector<8x256xf32>
    %c0_4 = arith.constant 0 : index
    %c0_5 = arith.constant 0 : index
    %5 = vector.load %arg4[%c0_4, %c0_5] : memref<8x1xf32, #tpu.memory_space<vmem>>, vector<8x1xf32>
    %6 = vector.broadcast %5 : vector<8x1xf32> to vector<8x256xf32>
    %7 = arith.addf %4, %6 : vector<8x256xf32>
    %c0_6 = arith.constant 0 : index
    %c0_7 = arith.constant 0 : index
    %c0_8 = arith.constant 0 : index
    %8 = vector.load %arg2[%c0_6, %c0_7, %c0_8] : memref<1x8x256xf32, #tpu.memory_space<vmem>>, vector<1x8x256xf32>
    %9 = vector.shape_cast %8 : vector<1x8x256xf32> to vector<8x256xf32>
    %c0_9 = arith.constant 0 : index
    %c0_10 = arith.constant 0 : index
    %10 = vector.load %arg5[%c0_9, %c0_10] : memref<2x8xbf16, #tpu.memory_space<vmem>>, vector<2x8xbf16>
    %11 = arith.truncf %7 : vector<8x256xf32> to vector<8x256xbf16>
    %cst_11 = arith.constant dense<0.000000e+00> : vector<2x256xf32>
    %12 = tpu.matmul %10, %11, %cst_11 {dimension_numbers = #tpu.dot_dimension_numbers<[1], [0], [0], [1], [0, 0, 1, 1], [], []>} : vector<2x8xbf16>, vector<8x256xbf16>, vector<2x256xf32> -> vector<2x256xf32>
    %c0_12 = arith.constant 0 : index
    %c0_13 = arith.constant 0 : index
    %13 = vector.load %arg6[%c0_12, %c0_13] : memref<2x8xbf16, #tpu.memory_space<vmem>>, vector<2x8xbf16>
    %14 = arith.truncf %9 : vector<8x256xf32> to vector<8x256xbf16>
    %cst_14 = arith.constant dense<0.000000e+00> : vector<2x256xf32>
    %15 = tpu.matmul %13, %14, %cst_14 {dimension_numbers = #tpu.dot_dimension_numbers<[1], [0], [0], [1], [0, 0, 1, 1], [], []>} : vector<2x8xbf16>, vector<8x256xbf16>, vector<2x256xf32> -> vector<2x256xf32>
    %16 = arith.addf %12, %15 : vector<2x256xf32>
    %c0_15 = arith.constant 0 : index
    %c0_16 = arith.constant 0 : index
    %17 = vector.load %arg7[%c0_15, %c0_16] : memref<2x1xf32, #tpu.memory_space<vmem>>, vector<2x1xf32>
    %18 = vector.broadcast %17 : vector<2x1xf32> to vector<2x256xf32>
    %19 = arith.addf %16, %18 : vector<2x256xf32>
    %20 = arith.negf %19 : vector<2x256xf32>
    %21 = math.exp %20 : vector<2x256xf32>
    %cst_17 = arith.constant 1.000000e+00 : f32
    %22 = vector.broadcast %cst_17 : f32 to vector<2x256xf32>
    %23 = arith.addf %22, %21 : vector<2x256xf32>
    %24 = arith.divf %22, %23 : vector<2x256xf32>
    %25 = vector.extract_strided_slice %24 {offsets = [0, 0], sizes = [1, 256], strides = [1, 1]} : vector<2x256xf32> to vector<1x256xf32>
    %26 = vector.broadcast %25 : vector<1x256xf32> to vector<8x256xf32>
    %27 = arith.mulf %7, %26 : vector<8x256xf32>
    %28 = vector.extract_strided_slice %24 {offsets = [1, 0], sizes = [1, 256], strides = [1, 1]} : vector<2x256xf32> to vector<1x256xf32>
    %29 = vector.broadcast %28 : vector<1x256xf32> to vector<8x256xf32>
    %30 = arith.mulf %9, %29 : vector<8x256xf32>
    %31 = arith.addf %27, %30 : vector<8x256xf32>
    %c0_18 = arith.constant 0 : index
    %c0_19 = arith.constant 0 : index
    %c0_20 = arith.constant 0 : index
    %32 = vector.load %arg12[%c0_18, %c0_19, %c0_20] : memref<1x8x256xf32, #tpu.memory_space<vmem>>, vector<1x8x256xf32>
    %33 = vector.shape_cast %32 : vector<1x8x256xf32> to vector<8x256xf32>
    %34 = vector.shape_cast %31 : vector<8x256xf32> to vector<1x8x256xf32>
    tpu.vector_store %arg12[%c0_18, %c0_19, %c0_20], %34 {strides = array<i32>} : memref<1x8x256xf32, #tpu.memory_space<vmem>>, vector<1x8x256xf32>,
    %cst_21 = arith.constant 0.000000e+00 : f32
    %35 = vector.broadcast %cst_21 : f32 to vector<16x256xf32>
    %c17_i32 = arith.constant 17 : i32
    %36 = tpu.dynamic_rotate %31 by %c17_i32 dim 1 : vector<8x256xf32>, i32 -> vector<8x256xf32>
    %c0_22 = arith.constant 0 : index
    %c0_23 = arith.constant 0 : index
    %37 = vector.load %arg10[%c0_22, %c0_23] : memref<9x256xf32, #tpu.memory_space<vmem>>, vector<1x256xf32>
    %38 = vector.broadcast %37 : vector<1x256xf32> to vector<8x256xf32>
    %39 = arith.mulf %36, %38 : vector<8x256xf32>
    %40 = arith.truncf %39 : vector<8x256xf32> to vector<8x256xbf16>
    %c0_24 = arith.constant 0 : index
    %c0_25 = arith.constant 0 : index
    %c0_26 = arith.constant 0 : index
    %41 = vector.load %arg8[%c0_24, %c0_25, %c0_26] : memref<9x16x8xbf16, #tpu.memory_space<vmem>>, vector<1x16x8xbf16>
    %42 = vector.shape_cast %41 : vector<1x16x8xbf16> to vector<16x8xbf16>
    %cst_27 = arith.constant dense<0.000000e+00> : vector<16x256xf32>
    %43 = tpu.matmul %42, %40, %cst_27 {dimension_numbers = #tpu.dot_dimension_numbers<[1], [0], [0], [1], [0, 0, 1, 1], [], []>} : vector<16x8xbf16>, vector<8x256xbf16>, vector<16x256xf32> -> vector<16x256xf32>
    %44 = arith.addf %35, %43 : vector<16x256xf32>
    %c16_i32 = arith.constant 16 : i32
    %45 = tpu.dynamic_rotate %31 by %c16_i32 dim 1 : vector<8x256xf32>, i32 -> vector<8x256xf32>
    %c1 = arith.constant 1 : index
    %c0_28 = arith.constant 0 : index
    %46 = vector.load %arg10[%c1, %c0_28] : memref<9x256xf32, #tpu.memory_space<vmem>>, vector<1x256xf32>
    %47 = vector.broadcast %46 : vector<1x256xf32> to vector<8x256xf32>
    %48 = arith.mulf %45, %47 : vector<8x256xf32>
    %49 = arith.truncf %48 : vector<8x256xf32> to vector<8x256xbf16>
    %c1_29 = arith.constant 1 : index
    %c0_30 = arith.constant 0 : index
    %c0_31 = arith.constant 0 : index
    %50 = vector.load %arg8[%c1_29, %c0_30, %c0_31] : memref<9x16x8xbf16, #tpu.memory_space<vmem>>, vector<1x16x8xbf16>
    %51 = vector.shape_cast %50 : vector<1x16x8xbf16> to vector<16x8xbf16>
    %cst_32 = arith.constant dense<0.000000e+00> : vector<16x256xf32>
    %52 = tpu.matmul %51, %49, %cst_32 {dimension_numbers = #tpu.dot_dimension_numbers<[1], [0], [0], [1], [0, 0, 1, 1], [], []>} : vector<16x8xbf16>, vector<8x256xbf16>, vector<16x256xf32> -> vector<16x256xf32>
    %53 = arith.addf %44, %52 : vector<16x256xf32>
    %c15_i32 = arith.constant 15 : i32
    %54 = tpu.dynamic_rotate %31 by %c15_i32 dim 1 : vector<8x256xf32>, i32 -> vector<8x256xf32>
    %c2 = arith.constant 2 : index
    %c0_33 = arith.constant 0 : index
    %55 = vector.load %arg10[%c2, %c0_33] : memref<9x256xf32, #tpu.memory_space<vmem>>, vector<1x256xf32>
    %56 = vector.broadcast %55 : vector<1x256xf32> to vector<8x256xf32>
    %57 = arith.mulf %54, %56 : vector<8x256xf32>
    %58 = arith.truncf %57 : vector<8x256xf32> to vector<8x256xbf16>
    %c2_34 = arith.constant 2 : index
    %c0_35 = arith.constant 0 : index
    %c0_36 = arith.constant 0 : index
    %59 = vector.load %arg8[%c2_34, %c0_35, %c0_36] : memref<9x16x8xbf16, #tpu.memory_space<vmem>>, vector<1x16x8xbf16>
    %60 = vector.shape_cast %59 : vector<1x16x8xbf16> to vector<16x8xbf16>
    %cst_37 = arith.constant dense<0.000000e+00> : vector<16x256xf32>
    %61 = tpu.matmul %60, %58, %cst_37 {dimension_numbers = #tpu.dot_dimension_numbers<[1], [0], [0], [1], [0, 0, 1, 1], [], []>} : vector<16x8xbf16>, vector<8x256xbf16>, vector<16x256xf32> -> vector<16x256xf32>
    %62 = arith.addf %53, %61 : vector<16x256xf32>
    %c1_i32 = arith.constant 1 : i32
    %63 = tpu.dynamic_rotate %31 by %c1_i32 dim 1 : vector<8x256xf32>, i32 -> vector<8x256xf32>
    %c3 = arith.constant 3 : index
    %c0_38 = arith.constant 0 : index
    %64 = vector.load %arg10[%c3, %c0_38] : memref<9x256xf32, #tpu.memory_space<vmem>>, vector<1x256xf32>
    %65 = vector.broadcast %64 : vector<1x256xf32> to vector<8x256xf32>
    %66 = arith.mulf %63, %65 : vector<8x256xf32>
    %67 = arith.truncf %66 : vector<8x256xf32> to vector<8x256xbf16>
    %c3_39 = arith.constant 3 : index
    %c0_40 = arith.constant 0 : index
    %c0_41 = arith.constant 0 : index
    %68 = vector.load %arg8[%c3_39, %c0_40, %c0_41] : memref<9x16x8xbf16, #tpu.memory_space<vmem>>, vector<1x16x8xbf16>
    %69 = vector.shape_cast %68 : vector<1x16x8xbf16> to vector<16x8xbf16>
    %cst_42 = arith.constant dense<0.000000e+00> : vector<16x256xf32>
    %70 = tpu.matmul %69, %67, %cst_42 {dimension_numbers = #tpu.dot_dimension_numbers<[1], [0], [0], [1], [0, 0, 1, 1], [], []>} : vector<16x8xbf16>, vector<8x256xbf16>, vector<16x256xf32> -> vector<16x256xf32>
    %71 = arith.addf %62, %70 : vector<16x256xf32>
    %c4 = arith.constant 4 : index
    %c0_43 = arith.constant 0 : index
    %72 = vector.load %arg10[%c4, %c0_43] : memref<9x256xf32, #tpu.memory_space<vmem>>, vector<1x256xf32>
    %73 = vector.broadcast %72 : vector<1x256xf32> to vector<8x256xf32>
    %74 = arith.mulf %31, %73 : vector<8x256xf32>
    %75 = arith.truncf %74 : vector<8x256xf32> to vector<8x256xbf16>
    %c4_44 = arith.constant 4 : index
    %c0_45 = arith.constant 0 : index
    %c0_46 = arith.constant 0 : index
    %76 = vector.load %arg8[%c4_44, %c0_45, %c0_46] : memref<9x16x8xbf16, #tpu.memory_space<vmem>>, vector<1x16x8xbf16>
    %77 = vector.shape_cast %76 : vector<1x16x8xbf16> to vector<16x8xbf16>
    %cst_47 = arith.constant dense<0.000000e+00> : vector<16x256xf32>
    %78 = tpu.matmul %77, %75, %cst_47 {dimension_numbers = #tpu.dot_dimension_numbers<[1], [0], [0], [1], [0, 0, 1, 1], [], []>} : vector<16x8xbf16>, vector<8x256xbf16>, vector<16x256xf32> -> vector<16x256xf32>
    %79 = arith.addf %71, %78 : vector<16x256xf32>
    %c255_i32 = arith.constant 255 : i32
    %80 = tpu.dynamic_rotate %31 by %c255_i32 dim 1 : vector<8x256xf32>, i32 -> vector<8x256xf32>
    %c5 = arith.constant 5 : index
    %c0_48 = arith.constant 0 : index
    %81 = vector.load %arg10[%c5, %c0_48] : memref<9x256xf32, #tpu.memory_space<vmem>>, vector<1x256xf32>
    %82 = vector.broadcast %81 : vector<1x256xf32> to vector<8x256xf32>
    %83 = arith.mulf %80, %82 : vector<8x256xf32>
    %84 = arith.truncf %83 : vector<8x256xf32> to vector<8x256xbf16>
    %c5_49 = arith.constant 5 : index
    %c0_50 = arith.constant 0 : index
    %c0_51 = arith.constant 0 : index
    %85 = vector.load %arg8[%c5_49, %c0_50, %c0_51] : memref<9x16x8xbf16, #tpu.memory_space<vmem>>, vector<1x16x8xbf16>
    %86 = vector.shape_cast %85 : vector<1x16x8xbf16> to vector<16x8xbf16>
    %cst_52 = arith.constant dense<0.000000e+00> : vector<16x256xf32>
    %87 = tpu.matmul %86, %84, %cst_52 {dimension_numbers = #tpu.dot_dimension_numbers<[1], [0], [0], [1], [0, 0, 1, 1], [], []>} : vector<16x8xbf16>, vector<8x256xbf16>, vector<16x256xf32> -> vector<16x256xf32>
    %88 = arith.addf %79, %87 : vector<16x256xf32>
    %c241_i32 = arith.constant 241 : i32
    %89 = tpu.dynamic_rotate %31 by %c241_i32 dim 1 : vector<8x256xf32>, i32 -> vector<8x256xf32>
    %c6 = arith.constant 6 : index
    %c0_53 = arith.constant 0 : index
    %90 = vector.load %arg10[%c6, %c0_53] : memref<9x256xf32, #tpu.memory_space<vmem>>, vector<1x256xf32>
    %91 = vector.broadcast %90 : vector<1x256xf32> to vector<8x256xf32>
    %92 = arith.mulf %89, %91 : vector<8x256xf32>
    %93 = arith.truncf %92 : vector<8x256xf32> to vector<8x256xbf16>
    %c6_54 = arith.constant 6 : index
    %c0_55 = arith.constant 0 : index
    %c0_56 = arith.constant 0 : index
    %94 = vector.load %arg8[%c6_54, %c0_55, %c0_56] : memref<9x16x8xbf16, #tpu.memory_space<vmem>>, vector<1x16x8xbf16>
    %95 = vector.shape_cast %94 : vector<1x16x8xbf16> to vector<16x8xbf16>
    %cst_57 = arith.constant dense<0.000000e+00> : vector<16x256xf32>
    %96 = tpu.matmul %95, %93, %cst_57 {dimension_numbers = #tpu.dot_dimension_numbers<[1], [0], [0], [1], [0, 0, 1, 1], [], []>} : vector<16x8xbf16>, vector<8x256xbf16>, vector<16x256xf32> -> vector<16x256xf32>
    %97 = arith.addf %88, %96 : vector<16x256xf32>
    %c240_i32 = arith.constant 240 : i32
    %98 = tpu.dynamic_rotate %31 by %c240_i32 dim 1 : vector<8x256xf32>, i32 -> vector<8x256xf32>
    %c7 = arith.constant 7 : index
    %c0_58 = arith.constant 0 : index
    %99 = vector.load %arg10[%c7, %c0_58] : memref<9x256xf32, #tpu.memory_space<vmem>>, vector<1x256xf32>
    %100 = vector.broadcast %99 : vector<1x256xf32> to vector<8x256xf32>
    %101 = arith.mulf %98, %100 : vector<8x256xf32>
    %102 = arith.truncf %101 : vector<8x256xf32> to vector<8x256xbf16>
    %c7_59 = arith.constant 7 : index
    %c0_60 = arith.constant 0 : index
    %c0_61 = arith.constant 0 : index
    %103 = vector.load %arg8[%c7_59, %c0_60, %c0_61] : memref<9x16x8xbf16, #tpu.memory_space<vmem>>, vector<1x16x8xbf16>
    %104 = vector.shape_cast %103 : vector<1x16x8xbf16> to vector<16x8xbf16>
    %cst_62 = arith.constant dense<0.000000e+00> : vector<16x256xf32>
    %105 = tpu.matmul %104, %102, %cst_62 {dimension_numbers = #tpu.dot_dimension_numbers<[1], [0], [0], [1], [0, 0, 1, 1], [], []>} : vector<16x8xbf16>, vector<8x256xbf16>, vector<16x256xf32> -> vector<16x256xf32>
    %106 = arith.addf %97, %105 : vector<16x256xf32>
    %c239_i32 = arith.constant 239 : i32
    %107 = tpu.dynamic_rotate %31 by %c239_i32 dim 1 : vector<8x256xf32>, i32 -> vector<8x256xf32>
    %c8 = arith.constant 8 : index
    %c0_63 = arith.constant 0 : index
    %108 = vector.load %arg10[%c8, %c0_63] : memref<9x256xf32, #tpu.memory_space<vmem>>, vector<1x256xf32>
    %109 = vector.broadcast %108 : vector<1x256xf32> to vector<8x256xf32>
    %110 = arith.mulf %107, %109 : vector<8x256xf32>
    %111 = arith.truncf %110 : vector<8x256xf32> to vector<8x256xbf16>
    %c8_64 = arith.constant 8 : index
    %c0_65 = arith.constant 0 : index
    %c0_66 = arith.constant 0 : index
    %112 = vector.load %arg8[%c8_64, %c0_65, %c0_66] : memref<9x16x8xbf16, #tpu.memory_space<vmem>>, vector<1x16x8xbf16>
    %113 = vector.shape_cast %112 : vector<1x16x8xbf16> to vector<16x8xbf16>
    %cst_67 = arith.constant dense<0.000000e+00> : vector<16x256xf32>
    %114 = tpu.matmul %113, %111, %cst_67 {dimension_numbers = #tpu.dot_dimension_numbers<[1], [0], [0], [1], [0, 0, 1, 1], [], []>} : vector<16x8xbf16>, vector<8x256xbf16>, vector<16x256xf32> -> vector<16x256xf32>
    %115 = arith.addf %106, %114 : vector<16x256xf32>
    %c0_68 = arith.constant 0 : index
    %c0_69 = arith.constant 0 : index
    %116 = vector.load %arg9[%c0_68, %c0_69] : memref<16x1xf32, #tpu.memory_space<vmem>>, vector<16x1xf32>
    %117 = vector.broadcast %116 : vector<16x1xf32> to vector<16x256xf32>
    %118 = arith.addf %115, %117 : vector<16x256xf32>
    %c0_70 = arith.constant 0 : index
    %c0_71 = arith.constant 0 : index
    %c0_72 = arith.constant 0 : index
    %119 = vector.load %arg11[%c0_70, %c0_71, %c0_72] : memref<1x16x256xf32, #tpu.memory_space<vmem>>, vector<1x16x256xf32>
    %120 = vector.shape_cast %119 : vector<1x16x256xf32> to vector<16x256xf32>
    %121 = vector.shape_cast %118 : vector<16x256xf32> to vector<1x16x256xf32>
    tpu.vector_store %arg11[%c0_70, %c0_71, %c0_72], %121 {strides = array<i32>} : memref<1x16x256xf32, #tpu.memory_space<vmem>>, vector<1x16x256xf32>,
    return
  }
  func.func @transform_0(%arg0: i32) -> (i32, i32, i32) {
    %c0_i32 = arith.constant 0 : i32
    %c0_i32_0 = arith.constant 0 : i32
    %c0_i32_1 = arith.constant 0 : i32
    return %arg0, %c0_i32, %c0_i32_0 : i32, i32, i32
  }
  func.func @transform_1(%arg0: i32) -> (i32, i32, i32) {
    %c0_i32 = arith.constant 0 : i32
    %c0_i32_0 = arith.constant 0 : i32
    %c0_i32_1 = arith.constant 0 : i32
    return %arg0, %c0_i32, %c0_i32_0 : i32, i32, i32
  }
  func.func @transform_2(%arg0: i32) -> (i32, i32) {
    %c0_i32 = arith.constant 0 : i32
    %c0_i32_0 = arith.constant 0 : i32
    %c0_i32_1 = arith.constant 0 : i32
    return %c0_i32, %c0_i32_0 : i32, i32
  }
  func.func @transform_3(%arg0: i32) -> (i32, i32) {
    %c0_i32 = arith.constant 0 : i32
    %c0_i32_0 = arith.constant 0 : i32
    %c0_i32_1 = arith.constant 0 : i32
    return %c0_i32, %c0_i32_0 : i32, i32
  }
  func.func @transform_4(%arg0: i32) -> (i32, i32) {
    %c0_i32 = arith.constant 0 : i32
    %c0_i32_0 = arith.constant 0 : i32
    %c0_i32_1 = arith.constant 0 : i32
    return %c0_i32, %c0_i32_0 : i32, i32
  }
  func.func @transform_5(%arg0: i32) -> (i32, i32) {
    %c0_i32 = arith.constant 0 : i32
    %c0_i32_0 = arith.constant 0 : i32
    %c0_i32_1 = arith.constant 0 : i32
    return %c0_i32, %c0_i32_0 : i32, i32
  }
  func.func @transform_6(%arg0: i32) -> (i32, i32) {
    %c0_i32 = arith.constant 0 : i32
    %c0_i32_0 = arith.constant 0 : i32
    %c0_i32_1 = arith.constant 0 : i32
    return %c0_i32, %c0_i32_0 : i32, i32
  }
  func.func @transform_7(%arg0: i32) -> (i32, i32, i32) {
    %c0_i32 = arith.constant 0 : i32
    %c0_i32_0 = arith.constant 0 : i32
    %c0_i32_1 = arith.constant 0 : i32
    %c0_i32_2 = arith.constant 0 : i32
    return %c0_i32, %c0_i32_0, %c0_i32_1 : i32, i32, i32
  }
  func.func @transform_8(%arg0: i32) -> (i32, i32) {
    %c0_i32 = arith.constant 0 : i32
    %c0_i32_0 = arith.constant 0 : i32
    %c0_i32_1 = arith.constant 0 : i32
    return %c0_i32, %c0_i32_0 : i32, i32
  }
  func.func @transform_9(%arg0: i32) -> (i32, i32) {
    %c0_i32 = arith.constant 0 : i32
    %c0_i32_0 = arith.constant 0 : i32
    %c0_i32_1 = arith.constant 0 : i32
    return %c0_i32, %c0_i32_0 : i32, i32
  }
  func.func @transform_10(%arg0: i32) -> (i32, i32, i32) {
    %c0_i32 = arith.constant 0 : i32
    %c0_i32_0 = arith.constant 0 : i32
    %c0_i32_1 = arith.constant 0 : i32
    return %arg0, %c0_i32, %c0_i32_0 : i32, i32, i32
  }
  func.func @transform_11(%arg0: i32) -> (i32, i32, i32) {
    %c0_i32 = arith.constant 0 : i32
    %c0_i32_0 = arith.constant 0 : i32
    %c0_i32_1 = arith.constant 0 : i32
    return %arg0, %c0_i32, %c0_i32_0 : i32, i32, i32
  }
}

</mosaic_0001>

<bundles_post_ra>
// kernel: abf_forward.1
= control target key start
LH: loop header
LB: loop body
LE: loop exit
PB: predicated region body
PF: predicated region fallthrough
CT: control target
= control target key end

     0   :  { %s1752_s17 = smov 0   ;;  %s1979_s0 = inlined_call_operand.vmem [shape: f32[2,16,256], index: 0, kind: input, shape index: {}]   ;;  %s1980_s1 = inlined_call_operand.vmem [shape: f32[2,8,256], index: 1, kind: input, shape index: {}]   ;;  %s1981_s2 = inlined_call_operand.vmem [shape: bf16[8,16], index: 2, kind: input, shape index: {}]   ;;  %s1982_s3 = inlined_call_operand.vmem [shape: f32[8,1], index: 3, kind: input, shape index: {}]   ;;  %s1983_s4 = inlined_call_operand.vmem [shape: bf16[2,8], index: 4, kind: input, shape index: {}]   ;;  %s1984_s5 = inlined_call_operand.vmem [shape: bf16[2,8], index: 5, kind: input, shape index: {}]   ;;  %s1985_s6 = inlined_call_operand.vmem [shape: f32[2,1], index: 6, kind: input, shape index: {}]   ;;  %s1986_s7 = inlined_call_operand.vmem [shape: bf16[9,16,8], index: 7, kind: input, shape index: {}]   ;;  %s1987_s8 = inlined_call_operand.vmem [shape: f32[16,1], index: 8, kind: input, shape index: {}]   ;;  %s1988_s9 = inlined_call_operand.vmem [shape: f32[9,256], index: 9, kind: input, shape index: {}]   ;;  %s1989_s10 = inlined_call_operand.vmem [shape: f32[2,16,256], index: 10, kind: output, shape index: {0}]   ;;  %s1990_s11 = inlined_call_operand.vmem [shape: f32[2,8,256], index: 11, kind: output, shape index: {1}]  }
   0x1 LB: > { %s1530_s18 = sadd.s32 4294967295, %s1681_s17   ;;  %p1534_p0 = scmp.ge.s32.totalorder %s1681_s17, 1  ;;  %s1681_s17 = sphi %s1752_s17, %s22_s17  }
   0x2   : > { %p350_p1 = scmp.lt.s32.totalorder %s1681_s17, 3 }
   0x4   : > { %p351_p2 = pnand %p1534_p0, %p350_p1 }
   0x5   : > { %p400_p3 = scmp.lt.s32.totalorder (!%p351_p2), %s1530_s18, 1  ;;  %v428_v0 = vld [vmem:[%s1982_s3] sm:$0xff] (!%p351_p2)  ;;  %v1683_v1 = vmov (!%p351_p2), 0   ;;  %vm491_vm0 = vcmask (!%p351_p2), 1043456   ;;  %vm434_vm1 = vcmask (!%p351_p2), 130048   ;;  %vm487_vm2 = vcmask (!%p351_p2), 64512  }
   0x6   : > { %354 = sbr.rel (%p351_p2) target bundleno = 900 (0x384), region = 60  ;;  %470 = vmatprep.mubr.bf16.mxu0 (!%p351_p2), %v1683_v1  ;;  %1656 = vset.pattern.permute.xlu0 (!%p351_p2), %v1683_v1  ;;  %v589_v2 = vld [vmem:[%s1985_s6] sm:$0x3] (!%p351_p2)  ;;  %v609_v45 = vlaneseq (!%p351_p2)  ;;  %s1684_s25 = smov (!%p351_p2), 127   ;;  %v1411_v63 = vld [vmem:[%s1987_s8 + $0x8] sm:$0xff] (!%p351_p2) }
   0x7   : > { %431 = vperm.xlu0 (!%p351_p2), %1656, %v428_v0   ;;  %962 = vmatprep.mubr.bf16.mxu1 (!%p351_p2), %v1683_v1  ;;  %v427_v13 = vld [vmem:[%s1981_s2] sm:$0xf] (!%p351_p2)  ;;  %s1685_s26 = smov (!%p351_p2), 1   ;;  %s1687_s28 = smov (!%p351_p2), 113  }
   0x8   : > { %1657 = vset.pattern.permute.xlu1 (!%p351_p2), %v1683_v1  ;;  %v484_v15 = vld [vmem:[%s1984_s5] sm:$0x1] (!%p351_p2)  ;;  %v610_v47 = vshrl.u32 (!%p351_p2), %v609_v45, 7  ;;  %s1689_s29 = smov (!%p351_p2), 112   ;;  %s1691_s12 = smov (!%p351_p2), 111   ;;  %v1831_v0 = vand.u32 (!%p351_p2), 127, %v609_v45 }
   0x9   : > { %v481_v26 = vld [vmem:[%s1983_s4] sm:$0x1] (!%p351_p2) }
   0xa   : > { %v1810_v48 = vsub.s32 (!%p351_p2), 0, %v610_v47  ;;  %v1812_v49 = vsub.s32 (!%p351_p2), 1, %v610_v47  ;;  %v1410_v62 = vld [vmem:[%s1987_s8] sm:$0xff] (!%p351_p2)  ;;  %vm893_vm3 = vcmp.lt.s32.totalorder (!%p351_p2), %v1831_v0, 1  ;;  %vm1062_vm4 = vcmp.lt.s32.totalorder (!%p351_p2), %v1831_v0, 127 }
   0xb   : > { %592 = vperm.xlu0 (!%p351_p2), %1656, %v589_v2   ;;  %v1571_v2 = vld [vmem:[%s1988_s9 + $0x4] ss:$8 sm:$0x3] (!%p351_p2)  ;;  %vm664_vm5 = vcmp.lt.s32.totalorder (!%p351_p2), %v1831_v0, 16  ;;  %vm1150_vm6 = vcmp.lt.s32.totalorder (!%p351_p2), %v1831_v0, 113  ;;  %vm639_vm7 = vcmp.lt.s32.totalorder (!%p351_p2), %v1831_v0, 17 }
   0xc   : > { %vm805_vm8 = vcmp.lt.s32.totalorder (!%p351_p2), %v1831_v0, 15  ;;  %vm1238_vm9 = vcmp.lt.s32.totalorder (!%p351_p2), %v1831_v0, 112  ;;  %vm1326_vm10 = vcmp.lt.s32.totalorder (!%p351_p2), %v1831_v0, 111  ;;  %v1666_v0 = vld [vmem:[%s1986_s7 + $0x40] sm:$0xff] (!%p351_p2)  }
   0xd   : > { %s1992_s18 = smov (!%p400_p3, %s1530_s18), 1 }
   0xe   : > { %s1603_s23 = sshll.u32 %s1992_s18, 5  ;;  %s1604_s24 = sshll.u32 %s1992_s18, 4 }
   0xf   : > { %s404_s27 = scalar_lea.vmem %s1979_s0, %s1603_s23  ;;  %s409_s30 = scalar_lea.vmem %s1980_s1, %s1604_s24 }
  0x10   : > { %v422_v3 = vld [vmem:[%s404_s27 + $0x8] sm:$0xff]  ;;  %v424_v4 = vld [vmem:[%s404_s27 + $0x18] sm:$0xff]  ;;  %v421_v5 = vld [vmem:[%s404_s27] sm:$0xff]  ;;  %s419_s22 = scalar_lea.vmem %s1990_s11, %s1604_s24  ;;  %s1688_s24 = smov 17  }
  0x11   : > { %v426_v6 = vpack.c.bf16 %v424_v4, %v422_v3  ;;  %v423_v7 = vld [vmem:[%s404_s27 + $0x10] sm:$0xff]  ;;  %v1784_v8 = vld [vmem:[%s409_s30 + $0x8] sm:$0xff]  ;;  %v1786_v9 = vld [vmem:[%s409_s30] sm:$0xff]  ;;  %s1686_s27 = smov 16   ;;  %s1690_s30 = smov 15  }
  0x12   : > { %v425_v10 = vpack.c.bf16 %v423_v7, %v421_v5  ;;  %v486_v11 = vpack.c.bf16 %v1784_v8, %v1784_v8  ;;  %v485_v12 = vpack.c.bf16 %v1786_v9, %v1786_v9  ;;  %v1565_v3 = vld [vmem:[%s1988_s9 + $0x3] ss:$8 sm:$0x3] }
  0x13   : > { %438 = vmatprep.subr.bf16.mxu0 %v426_v6  ;;  %v983_v6 = vrot.slane %v1571_v2, %v1810_v48  ;;  %v902_v7 = vrot.slane %v1565_v3, %v1810_v48 }
  0x14   : > { %439 = vmatpush1.bf16.msra.mxu0 %v425_v10  ;;  %v493_v14 = vsel %vm491_vm0, %v485_v12, 0  ;;  %v987_v10 = vrot.slane %v1571_v2, %v1812_v49 }
  0x15   : > { %1544 = vmatprep.subr.msk.bf16.mxu0 %vm491_vm0, %v486_v11 }
  0x17   : > { %1543 = vmatmul.mubr.msk.bf16.vlgmr.msra.gmra.mrb[0].mxu0 %vm434_vm1, %v427_v13 }
  0x18   : > { %499 = vmatpush1.bf16.msra.mxu0 %v493_v14  ;;  %530 = vmatprep.mubr.bf16.mxu0 %v1683_v1 }
  0x1f   : > { %1545 = vmatmul.mubr.msk.bf16.vlgmr.msra.gmra.mrb[4].mxu0 %vm487_vm2, %v484_v15 }
  0x20   : > { %580 = vmatprep.mubr.bf16.mxu0 %v1683_v1 }
  0x86   : > { %v432_v16 = vpop.permute.xlu0 %431 }
  0x8a   : > { %v593_v34 = vpop.permute.xlu0 %592 }
  0xea   : > { %v472_v17 = vpop.f32.mrb[0].mxu0 }
  0xeb   : > { %v473_v18 = vadd.f32 %v472_v17, %v432_v16  ;;  %v474_v19 = vpop.f32.mrb[1].mxu0 }
  0xec   : > { %v475_v20 = vadd.f32 %v474_v19, %v432_v16  ;;  %v476_v21 = vpop.f32.mrb[2].mxu0  ;;  %v1550_v19 = vld [vmem:[%s1988_s9 + $0x1] ss:$8 sm:$0x3] }
  0xed   : > { %v482_v22 = vpack.c.bf16 %v473_v18, %v473_v18  ;;  %v477_v23 = vpop.f32.mrb[3].mxu0 }
  0xee   : > { %v483_v24 = vpack.c.bf16 %v475_v20, %v475_v20 }
  0xef   : > { %v543_v25 = vsel %vm491_vm0, %v482_v22, 0 }
  0xf0   : > { %1546 = vmatprep.subr.msk.bf16.mxu0 %vm491_vm0, %v483_v24 }
  0xf1   : > { %549 = vmatpush1.bf16.msra.mxu0 %v543_v25  ;;  %v673_v25 = vrot.slane %v1550_v19, %v1810_v48 }
  0xf2   : > { %v532_v27 = vpop.f32.mrb[4].mxu0 }
  0xf3   : > { %v534_v28 = vpop.f32.mrb[5].mxu0 }
  0xf4   : > { %1547 = vmatmul.mubr.msk.bf16.vlgmr.msra.gmra.mrb[8].mxu0 %vm487_vm2, %v481_v26  ;;  %v536_v29 = vpop.f32.mrb[6].mxu0  ;;  %v677_v26 = vrot.slane %v1550_v19, %v1812_v49 }
  0xf5   : > { %733 = vmatprep.mubr.bf16.mxu0 %v1683_v1  ;;  %v537_v30 = vpop.f32.mrb[7].mxu0 }
 0x1c7   : > { %v582_v31 = vpop.f32.mrb[8].mxu0 }
 0x1c8   : > { %v583_v32 = vadd.f32 %v582_v31, %v532_v27  ;;  %v584_v33 = vpop.f32.mrb[9].mxu0  ;;  %v1658_v31 = vld [vmem:[%s1986_s7 + $0x18] sm:$0xff]  }
 0x1c9   : > { %v585_v35 = vadd.f32 %v584_v33, %v534_v28  ;;  %v586_v36 = vpop.f32.mrb[10].mxu0 }
 0x1ca   : > { %v595_v37 = vadd.f32 %v593_v34, %v583_v32  ;;  %v587_v38 = vpop.f32.mrb[11].mxu0 }
 0x1cb   : > { %v596_v39 = vadd.f32 %v593_v34, %v585_v35 }
 0x1cc   : > { %v1548_v40 = vmul.f32 -1.442695, %v595_v37 }
 0x1cd   : > { %v1549_v41 = vmul.f32 -1.442695, %v596_v39 }
 0x1ce   : > { %1667 = vpow2.f32 %v1548_v40 }
 0x1cf   : > { %1669 = vpow2.f32 %v1549_v41  ;;  %v1583_v41 = vld [vmem:[%s1988_s9 + $0x6] ss:$8 sm:$0x3] }
 0x1d8   : > { %v1668_v42 = vpop.eup %1667 }
 0x1d9   : > { %v1670_v43 = vpop.eup %1669  ;;  %v603_v44 = vadd.f32 1.0, %v1668_v42 }
 0x1da   : > { %v604_v46 = vadd.f32 1.0, %v1670_v43  ;;  %v642_v43 = vld [vmem:[%s1988_s9] ss:$8 sm:$0x3] }
 0x1db   : > { %1671 = vrcp.f32 %v603_v44 }
 0x1dc   : > { %1673 = vrcp.f32 %v604_v46 }
 0x1e5   : > { %v1672_v50 = vpop.eup %1671 }
 0x1e6   : > { %v1674_v51 = vpop.eup %1673  ;;  %v612_v52 = vrot.slane %v1672_v50, %v1810_v48  ;;  %v622_v53 = vrot.slane %v1672_v50, %v1812_v49  ;;  %v1163_v50 = vrot.slane %v1583_v41, %v1812_v49 }
 0x1e7   : > { %v616_v54 = vrot.slane %v1674_v51, %v1810_v48  ;;  %v626_v55 = vrot.slane %v1674_v51, %v1812_v49 }
 0x1e8   : > { %v617_v56 = vmul.f32 %v612_v52, %v473_v18  ;;  %v627_v57 = vmul.f32 %v622_v53, %v1786_v9  ;;  %v906_v9 = vrot.slane %v1565_v3, %v1812_v49  ;;  %v647_v53 = vrot.slane %v642_v43, %v1810_v48  ;;  %v1660_v3 = vld [vmem:[%s1986_s7 + $0x20] sm:$0xff]  }
 0x1e9   : > { %v618_v58 = vmul.f32 %v616_v54, %v475_v20  ;;  %v628_v59 = vmul.f32 %v626_v55, %v1784_v8  ;;  %v1577_v8 = vld [vmem:[%s1988_s9 + $0x5] ss:$8 sm:$0x3]  ;;  %v651_v54 = vrot.slane %v642_v43, %v1812_v49 }
 0x1ea   : > { %v629_v60 = vadd.f32 %v627_v57, %v617_v56  ;;  %v1075_v15 = vrot.slane %v1577_v8, %v1812_v49  ;;  %v1071_v34 = vrot.slane %v1577_v8, %v1810_v48  ;;  %v1659_v55 = vld [vmem:[%s1986_s7 + $0x8] sm:$0xff]   ;;  %v1159_v8 = vrot.slane %v1583_v41, %v1810_v48  ;;  %v1664_v41 = vld [vmem:[%s1986_s7 + $0x10] sm:$0xff]  }
 0x1eb   : > { %v630_v61 = vadd.f32 %v628_v59, %v618_v58 }
 0x1ec   : > { %631 = vst [vmem:[%s419_s22] sm:$0xff] %v629_v60  ;;  %1058 = vrot.lane.b32.xlu0 %v629_v60, %s1684_s25  ;;  %889 = vrot.lane.b32.xlu1 %v629_v60, %s1685_s26  ;;  %v990_v20 = vmul.f32 %v983_v6, %v629_v60 }
 0x1ed   : > { %632 = vst [vmem:[%s419_s22 + $0x8] sm:$0xff] %v630_v61  ;;  %v991_v18 = vmul.f32 %v987_v10, %v630_v61 }
 0x1ee   : > { %v992_v32 = vpack.c.bf16 %v990_v20, %v990_v20 }
 0x1ef   : > { %v993_v30 = vpack.c.bf16 %v991_v18, %v991_v18 }
 0x1f0   : > { %660 = vrot.lane.b32.xlu0 %v629_v60, %s1686_s27  ;;  %891 = vrot.lane.b32.xlu1 %v630_v61, %s1685_s26  ;;  %v1006_v40 = vsel %vm491_vm0, %v992_v32, 0 }
 0x1f4   : > { %1146 = vrot.lane.b32.xlu0 %v629_v60, %s1687_s28  ;;  %1060 = vrot.lane.b32.xlu1 %v630_v61, %s1684_s25 }
 0x1f8   : > { %633 = vrot.lane.b32.xlu0 %v629_v60, %s1688_s24  ;;  %662 = vrot.lane.b32.xlu1 %v630_v61, %s1686_s27  ;;  %s414_s27 = scalar_lea.vmem %s1989_s10, %s1603_s23 }
 0x1fc   : > { %1234 = vrot.lane.b32.xlu0 %v629_v60, %s1689_s29  ;;  %1148 = vrot.lane.b32.xlu1 %v630_v61, %s1687_s28 }
 0x200   : > { %801 = vrot.lane.b32.xlu0 %v629_v60, %s1690_s30  ;;  %635 = vrot.lane.b32.xlu1 %v630_v61, %s1688_s24 }
 0x204   : > { %1322 = vrot.lane.b32.xlu0 %v629_v60, %s1691_s12  ;;  %1236 = vrot.lane.b32.xlu1 %v630_v61, %s1689_s29 }
 0x208   : > { %1414 = vperm.xlu0 %1656, %v1410_v62   ;;  %803 = vrot.lane.b32.xlu1 %v630_v61, %s1690_s30 }
 0x20c   : > { %1324 = vrot.lane.b32.xlu1 %v630_v61, %s1691_s12 }
 0x210   : > { %1419 = vperm.xlu1 %1657, %v1411_v63  }
 0x25e   : > { %v1059_v4 = vpop.permute.xlu0 %1058  ;;  %v890_v5 = vpop.permute.xlu1 %889 }
 0x262   : > { %v661_v11 = vpop.permute.xlu0 %660  ;;  %v892_v12 = vpop.permute.xlu1 %891 }
 0x263   : > { %v894_v13 = vsel %vm893_vm3, %v890_v5, %v892_v12  ;;  %v895_v14 = vsel %vm893_vm3, %v892_v12, %v890_v5 }
 0x264   : > { %v909_v16 = vmul.f32 %v902_v7, %v895_v14  ;;  %v910_v17 = vmul.f32 %v906_v9, %v894_v13 }
 0x266   : > { %v1061_v21 = vpop.permute.xlu1 %1060  ;;  %v912_v22 = vpack.c.bf16 %v910_v17, %v910_v17  ;;  %v911_v23 = vpack.c.bf16 %v909_v16, %v909_v16  ;;  %v1857_v27 = vpop.permute.xlu0 %1146 }
 0x267   : > { %v1064_v24 = vsel %vm1062_vm4, %v1061_v21, %v1059_v4  ;;  %v1063_v42 = vsel %vm1062_vm4, %v1059_v4, %v1061_v21  ;;  %v1559_v4 = vld [vmem:[%s1988_s9 + $0x2] ss:$8 sm:$0x3] }
 0x268   : > { %v1079_v28 = vmul.f32 %v1075_v15, %v1064_v24  ;;  %1569 = vmatprep.subr.msk.bf16.mxu1 %vm491_vm0, %v912_v22  ;;  %v925_v29 = vsel %vm491_vm0, %v911_v23, 0  ;;  %v1078_v51 = vmul.f32 %v1071_v34, %v1063_v42  ;;  %v814_v9 = vrot.slane %v1559_v4, %v1810_v48  ;;  %v1589_v15 = vld [vmem:[%s1988_s9 + $0x7] ss:$8 sm:$0x3] }
 0x269   : > { %931 = vmatpush1.bf16.msra.mxu1 %v925_v29  ;;  %v818_v13 = vrot.slane %v1559_v4, %v1812_v49  ;;  %v1251_v21 = vrot.slane %v1589_v15, %v1812_v49  ;;  %v1661_v24 = vld [vmem:[%s1986_s7] sm:$0xff]   ;;  %v1247_v32 = vrot.slane %v1589_v15, %v1810_v48 }
 0x26a   : > { %1575 = vmatprep.subr.msk.bf16.mxu1 %vm491_vm0, %v993_v30  ;;  %v663_v33 = vpop.permute.xlu1 %662  ;;  %v1081_v37 = vpack.c.bf16 %v1079_v28, %v1079_v28  ;;  %v634_v44 = vpop.permute.xlu0 %633  ;;  %v1080_v60 = vpack.c.bf16 %v1078_v51, %v1078_v51 }
 0x26b   : > { %v665_v35 = vsel %vm664_vm5, %v661_v11, %v663_v33  ;;  %v666_v36 = vsel %vm664_vm5, %v663_v33, %v661_v11 }
 0x26c   : > { %v680_v38 = vmul.f32 %v673_v25, %v666_v36  ;;  %v681_v39 = vmul.f32 %v677_v26, %v665_v35  ;;  %1570 = vmatmul.mubr.msk.bf16.vlgmr.msra.gmra.mrb[0].mxu1 %vm487_vm2, %v1658_v31  ;;  %v1094_v11 = vsel %vm491_vm0, %v1080_v60, 0  ;;  %v1662_v31 = vld [vmem:[%s1986_s7 + $0x28] sm:$0xff]   ;;  %v1595_v36 = vld [vmem:[%s1988_s9 + $0x10] ss:$8 sm:$0x3] }
 0x26d   : > { %1012 = vmatpush1.bf16.msra.mxu1 %v1006_v40  ;;  %1043 = vmatprep.mubr.bf16.mxu1 %v1683_v1  ;;  %v1339_v40 = vrot.slane %v1595_v36, %v1812_v49 }
 0x26e   : > { %v682_v45 = vpack.c.bf16 %v680_v38, %v680_v38  ;;  %v683_v46 = vpack.c.bf16 %v681_v39, %v681_v39  ;;  %v1149_v47 = vpop.permute.xlu1 %1148  ;;  %1581 = vmatprep.subr.msk.bf16.mxu1 %vm491_vm0, %v1081_v37  ;;  %v1235_v61 = vpop.permute.xlu0 %1234 }
 0x26f   : > { %v1152_v56 = vsel %vm1150_vm6, %v1149_v47, %v1857_v27  ;;  %v1151_v14 = vsel %vm1150_vm6, %v1857_v27, %v1149_v47 }
 0x270   : > { %1554 = vmatprep.subr.msk.bf16.mxu0 %vm491_vm0, %v683_v46  ;;  %v696_v52 = vsel %vm491_vm0, %v682_v45, 0  ;;  %v1167_v62 = vmul.f32 %v1163_v50, %v1152_v56  ;;  %v1166_v20 = vmul.f32 %v1159_v8, %v1151_v14  ;;  %v1663_v45 = vld [vmem:[%s1986_s7 + $0x30] sm:$0xff]   ;;  %v1335_v46 = vrot.slane %v1595_v36, %v1810_v48  ;;  %v1665_v48 = vld [vmem:[%s1986_s7 + $0x38] sm:$0xff]  }
 0x271   : > { %702 = vmatpush1.bf16.msra.mxu0 %v696_v52 }
 0x272   : > { %v636_v57 = vpop.permute.xlu1 %635  ;;  %v1169_v10 = vpack.c.bf16 %v1167_v62, %v1167_v62  ;;  %v802_v16 = vpop.permute.xlu0 %801  ;;  %v1168_v28 = vpack.c.bf16 %v1166_v20, %v1166_v20 }
 0x273   : > { %v640_v58 = vsel %vm639_vm7, %v634_v44, %v636_v57  ;;  %v641_v59 = vsel %vm639_vm7, %v636_v57, %v634_v44 }
 0x274   : > { %v654_v63 = vmul.f32 %v647_v53, %v641_v59  ;;  %v655_v2 = vmul.f32 %v651_v54, %v640_v58  ;;  %1555 = vmatmul.mubr.msk.bf16.vlgmr.msra.gmra.mrb[12].mxu0 %vm487_vm2, %v1659_v55  ;;  %v1182_v34 = vsel %vm491_vm0, %v1168_v28, 0 }
 0x275   : > { %790 = vmatprep.mubr.bf16.mxu0 %v1683_v1 }
 0x276   : > { %v656_v5 = vpack.c.bf16 %v654_v63, %v654_v63  ;;  %v657_v6 = vpack.c.bf16 %v655_v2, %v655_v2  ;;  %v1237_v7 = vpop.permute.xlu1 %1236  ;;  %v1323_v38 = vpop.permute.xlu0 %1322 }
 0x277   : > { %v1240_v25 = vsel %vm1238_vm9, %v1237_v7, %v1235_v61  ;;  %v1239_v35 = vsel %vm1238_vm9, %v1235_v61, %v1237_v7 }
 0x278   : > { %1557 = vmatprep.subr.msk.bf16.mxu0 %vm491_vm0, %v657_v6  ;;  %1576 = vmatmul.mubr.msk.bf16.vlgmr.msra.gmra.mrb[0].mxu1 %vm487_vm2, %v1660_v3  ;;  %v753_v12 = vsel %vm491_vm0, %v656_v5, 0  ;;  %v1255_v29 = vmul.f32 %v1251_v21, %v1240_v25  ;;  %v1254_v39 = vmul.f32 %v1247_v32, %v1239_v35 }
 0x279   : > { %1100 = vmatpush1.bf16.msra.mxu1 %v1094_v11  ;;  %759 = vmatpush1.bf16.msra.mxu0 %v753_v12 }
 0x27a   : > { %1587 = vmatprep.subr.msk.bf16.mxu1 %vm491_vm0, %v1169_v10  ;;  %v804_v17 = vpop.permute.xlu1 %803  ;;  %1131 = vmatprep.mubr.bf16.mxu1 %v1683_v1  ;;  %v1257_v33 = vpack.c.bf16 %v1255_v29, %v1255_v29  ;;  %v1256_v43 = vpack.c.bf16 %v1254_v39, %v1254_v39 }
 0x27b   : > { %v806_v18 = vsel %vm805_vm8, %v802_v16, %v804_v17  ;;  %v807_v19 = vsel %vm805_vm8, %v804_v17, %v802_v16 }
 0x27c   : > { %v821_v22 = vmul.f32 %v814_v9, %v807_v19  ;;  %v822_v23 = vmul.f32 %v818_v13, %v806_v18  ;;  %v1270_v49 = vsel %vm491_vm0, %v1256_v43, 0 }
 0x27e   : > { %v823_v26 = vpack.c.bf16 %v821_v22, %v821_v22  ;;  %v824_v27 = vpack.c.bf16 %v822_v23, %v822_v23  ;;  %v1325_v37 = vpop.permute.xlu1 %1324 }
 0x27f   : > { %v1328_v42 = vsel %vm1326_vm10, %v1325_v37, %v1323_v38  ;;  %v1327_v50 = vsel %vm1326_vm10, %v1323_v38, %v1325_v37 }
 0x280   : > { %1563 = vmatprep.subr.msk.bf16.mxu0 %vm491_vm0, %v824_v27  ;;  %1558 = vmatmul.mubr.msk.bf16.vlgmr.msra.gmra.mrb[12].mxu0 %vm487_vm2, %v1661_v24  ;;  %v837_v30 = vsel %vm491_vm0, %v823_v26, 0  ;;  %v1343_v44 = vmul.f32 %v1339_v40, %v1328_v42  ;;  %v1342_v51 = vmul.f32 %v1335_v46, %v1327_v50 }
 0x281   : > { %843 = vmatpush1.bf16.msra.mxu0 %v837_v30  ;;  %874 = vmatprep.mubr.bf16.mxu0 %v1683_v1 }
 0x282   : > { %v1345_v47 = vpack.c.bf16 %v1343_v44, %v1343_v44  ;;  %v1344_v52 = vpack.c.bf16 %v1342_v51, %v1342_v51 }
 0x284   : > { %1582 = vmatmul.mubr.msk.bf16.vlgmr.msra.gmra.mrb[0].mxu1 %vm487_vm2, %v1662_v31  ;;  %v1358_v53 = vsel %vm491_vm0, %v1344_v52, 0 }
 0x285   : > { %1188 = vmatpush1.bf16.msra.mxu1 %v1182_v34  ;;  %1219 = vmatprep.mubr.bf16.mxu1 %v1683_v1 }
 0x286   : > { %1593 = vmatprep.subr.msk.bf16.mxu1 %vm491_vm0, %v1257_v33 }
 0x287   : > { %v1415_v59 = vpop.permute.xlu0 %1414 }
 0x28c   : > { %1564 = vmatmul.mubr.msk.bf16.vlgmr.msra.gmra.mrb[12].mxu0 %vm487_vm2, %v1664_v41 }
 0x28f   : > { %v1420_v63 = vpop.permute.xlu1 %1419 }
 0x290   : > { %1588 = vmatmul.mubr.msk.bf16.vlgmr.msra.gmra.mrb[0].mxu1 %vm487_vm2, %v1663_v45 }
 0x291   : > { %1276 = vmatpush1.bf16.msra.mxu1 %v1270_v49  ;;  %1307 = vmatprep.mubr.bf16.mxu1 %v1683_v1 }
 0x292   : > { %1599 = vmatprep.subr.msk.bf16.mxu1 %vm491_vm0, %v1345_v47 }
 0x29c   : > { %1594 = vmatmul.mubr.msk.bf16.vlgmr.msra.gmra.mrb[0].mxu1 %vm487_vm2, %v1665_v48 }
 0x29d   : > { %1364 = vmatpush1.bf16.msra.mxu1 %v1358_v53  ;;  %1395 = vmatprep.mubr.bf16.mxu1 %v1683_v1 }
 0x2a8   : > { %1600 = vmatmul.mubr.msk.bf16.vlgmr.msra.gmra.mrb[0].mxu1 %vm487_vm2, %v1666_v0 }
 0x35f   : > { %v876_v54 = vpop.f32.mrb[12].mxu0 }
 0x360   : > { %v878_v55 = vpop.f32.mrb[13].mxu0 }
 0x361   : > { %v880_v56 = vpop.f32.mrb[14].mxu0 }
 0x362   : > { %v882_v57 = vpop.f32.mrb[15].mxu0 }
 0x37b   : > { %v1397_v58 = vpop.f32.mrb[0].mxu1 }
 0x37c   : > { %v1607_v60 = vadd.f32 %v1397_v58, %v876_v54  ;;  %v1399_v61 = vpop.f32.mrb[1].mxu1 }
 0x37d   : > { %v1608_v1 = vadd.f32 %v1399_v61, %v878_v55  ;;  %v1401_v62 = vpop.f32.mrb[2].mxu1 }
 0x37e   : > { %v1422_v2 = vadd.f32 %v1607_v60, %v1415_v59  ;;  %v1609_v3 = vadd.f32 %v1401_v62, %v880_v56  ;;  %v1403_v4 = vpop.f32.mrb[3].mxu1 }
 0x37f   : > { %v1423_v5 = vadd.f32 %v1608_v1, %v1415_v59  ;;  %v1610_v6 = vadd.f32 %v1403_v4, %v882_v57 }
 0x380   : > { %1426 = vst [vmem:[%s414_s27] sm:$0xff] %v1422_v2  ;;  %v1424_v7 = vadd.f32 %v1609_v3, %v1420_v63 }
 0x381   : > { %1427 = vst [vmem:[%s414_s27 + $0x8] sm:$0xff] %v1423_v5  ;;  %v1425_v8 = vadd.f32 %v1610_v6, %v1420_v63 }
 0x382   : > { %1428 = vst [vmem:[%s414_s27 + $0x10] sm:$0xff] %v1424_v7 }
 0x383   : > { %1429 = vst [vmem:[%s414_s27 + $0x18] sm:$0xff] %v1425_v8 }
 0x384 PF: > { %s22_s17 = sadd.s32 1, %s1681_s17  }
 0x385   : > { %p19_p4 = scmp.ge.s32.totalorder %s22_s17, 4  }
 0x387   :  { %21 = sbr.rel (!%p19_p4) target bundleno = 1 (0x1), region = 121 }

</bundles_post_ra>
